<compile_context>
chip_gen: v5e
topology: v5e:2x2
jax: 0.10.0
libtpu: 0.0.40
codegen_flags: <defaults>
</compile_context>

<pallas_src>
import functools

import jax
import jax.numpy as jnp
from jax import lax
from jax.experimental import pallas as pl
from jax.experimental.pallas import tpu as pltpu

_MiB = 1024 * 1024


def _round_up(x, m):
    return ((x + m - 1) // m) * m


def _tpu_vmem_capacity_bytes():
    """Physical per-TensorCore VMEM, or None if it cannot be determined."""
    try:
        return int(pltpu.get_tpu_info().vmem_capacity_bytes)
    except Exception:
        return None


def _gram_kernel(x_ref, g_ref, *, block_m, inv_norm, single_m_tile):
    # x_ref: (Mp, block_k)  — all feature rows for this K tile (single stream)
    # g_ref: (block_m, Mp)  — resident output row-block (block index constant
    #                         across the K axis); doubles as the f32 accumulator.
    i = pl.program_id(1)
    k = pl.program_id(2)
    nk = pl.num_programs(2)

    @pl.when(k == 0)
    def _init():
        g_ref[...] = jnp.zeros_like(g_ref)

    if single_m_tile:
        lhs = x_ref[...]
    else:
        start = pl.multiple_of(i * block_m, block_m)
        lhs = x_ref[pl.ds(start, block_m), :]

    # A . B^T on the MXU: contract the shared K (=H*W) axis of both operands
    # directly — no materialized transpose of the feature matrix.
    # TODO(synk): confirm via pl.lower_as_mlir that no hidden relayout/vxpose
    # is emitted for this form; if one appears, feed a pre-transposed (Kp, Mp)
    # RHS from the wrapper instead.
    g_ref[...] += lax.dot_general(
        lhs, x_ref[...],
        dimension_numbers=(((1,), (1,)), ((), ())),
        preferred_element_type=jnp.float32)

    @pl.when(k == nk - 1)
    def _finalize():
        g_ref[...] *= inv_norm


def gram_matrix_ref(x_nchw):
    """Plain-JAX gram_matrix (target setup / correctness check)."""
    a, b, c, d = x_nchw.shape
    feats = x_nchw.reshape(a * b, c * d).astype(jnp.float32)
    g = jnp.dot(feats, feats.T, precision=jax.lax.Precision.HIGHEST)
    return g / (a * b * c * d)


def precompute_target_stats(target_grams):
    """Module __init__ glue: collapse the T target grams into (mean, variance).

    loss = mean_t mse(G, t) = mean((G - t_mean)^2) + t_var   (exact identity)
    """
    tgts = jnp.stack([t.astype(jnp.float32) for t in target_grams], axis=0)
    t_mean = jnp.mean(tgts, axis=0)                 # (M, M)
    t_var = jnp.mean((tgts - t_mean[None]) ** 2)    # scalar, >= 0
    return t_mean, t_var


def gram_matrix_pallas(x_nchw, *, block_m=None, block_k=None, split_k_cores=None):
    """G = (F F^T) / (a*b*c*d) with F = x.reshape(a*b, c*d), via a Pallas kernel."""
    a, b, c, d = x_nchw.shape
    M, K = a * b, c * d
    norm = float(a * b * c * d)

    # Do NOT cast here: bf16 activations stream as bf16 (MXU peak, half the
    # HBM bytes); f32 stays f32. Accumulation is f32 either way.
    feats = x_nchw.reshape(M, K)
    itemsize = jnp.dtype(feats.dtype).itemsize

    # ---- generation-gated VMEM budgets -------------------------------------
    vmem_cap = _tpu_vmem_capacity_bytes()
    if vmem_cap is not None and vmem_cap >= 128 * _MiB:     # v5e / v6e
        kpair_budget = 14 * _MiB        # double-buffered (Mp, block_k) pair
        vmem_limit_cap = 100 * _MiB
    else:                                                   # v7x (64 MiB) / unknown
        kpair_budget = 6 * _MiB
        vmem_limit_cap = 52 * _MiB      # leave compiler scratch headroom

    # ---- M tiling (sublane 8; pad Mp to >=128 so the gram output is lane-dense)
    m_target = max(_round_up(M, 8), 128)
    if block_m is None:
        block_m = m_target if m_target <= 512 else 256
    block_m = _round_up(min(block_m, m_target), 8)
    Mp = _round_up(m_target, block_m)
    nm = Mp // block_m
    # TODO(synk): for nm > 1 (large M), exploit gram symmetry (only j >= i
    # blocks) — irrelevant for standard style loss where M <= 512.

    # ---- K tiling (lane 128), capped by the per-generation VMEM budget -----
    k128 = _round_up(K, 128)
    if block_k is None:
        cap = kpair_budget // max(1, 2 * Mp * itemsize)
        cap = max(128, (cap // 128) * 128)
        block_k = min(k128, cap)
    block_k = max(128, _round_up(block_k, 128))
    nk_total = pl.cdiv(k128, block_k)

    # ---- optional split of the K reduction across v7x's two TensorCores ----
    if split_k_cores is None:
        is_v7x = vmem_cap is not None and vmem_cap <= 64 * _MiB
        split_k_cores = 2 if (is_v7x and nm == 1 and nk_total >= 2) else 1
    split_k_cores = max(1, int(split_k_cores))
    nk_total = _round_up(nk_total, split_k_cores)
    nk_core = nk_total // split_k_cores
    Kp = nk_total * block_k

    if (Mp, Kp) != (M, K):
        feats = jnp.pad(feats, ((0, Mp - M), (0, Kp - K)))

    kernel = functools.partial(
        _gram_kernel, block_m=block_m, inv_norm=1.0 / norm,
        single_m_tile=(nm == 1))

    # Double-buffered feature tile + output tile, 1.5x headroom, clamped per
    # generation (never the full physical VMEM).
    est = 2 * Mp * block_k * itemsize + 2 * block_m * Mp * 4
    vmem_limit = int(min(max(int(1.5 * est) + 4 * _MiB, 16 * _MiB), vmem_limit_cap))

    g_parts = pl.pallas_call(
        kernel,
        grid=(split_k_cores, nm, nk_core),
        in_specs=[
            # Single feature stream: full-M tile for this (core, K) block; the
            # lhs row block is sliced from it in-kernel.
            pl.BlockSpec((Mp, block_k),
                         lambda c, i, k, _nkc=nk_core: (0, c * _nkc + k)),
        ],
        out_specs=pl.BlockSpec((None, block_m, Mp), lambda c, i, k: (c, i, 0)),
        out_shape=jax.ShapeDtypeStruct((split_k_cores, Mp, Mp), jnp.float32),
        compiler_params=pltpu.CompilerParams(
            dimension_semantics=("parallel", "parallel", "arbitrary"),
            vmem_limit_bytes=vmem_limit),
    )(feats)

    g_pad = g_parts[0] if split_k_cores == 1 else jnp.sum(g_parts, axis=0)
    return g_pad[:M, :M]


def style_loss_forward(x_nchw, target_mean, target_var, *,
                       block_m=None, block_k=None, split_k_cores=None):
    """Mirrors StyleLoss.forward: returns (input, loss, gram)."""
    g = gram_matrix_pallas(x_nchw, block_m=block_m, block_k=block_k,
                           split_k_cores=split_k_cores)
    # Cancellation-free expansion of mean_t mse(G, t); tiny M x M epilogue kept
    # out of the hot K-streaming loop (frees VMEM for a larger block_k).
    loss = jnp.mean((g - target_mean.astype(jnp.float32)) ** 2) + target_var
    # forward() returns its input unchanged; the loss is a side product
    # (the PyTorch module stashes it in self.loss).
    return x_nchw, loss, g


if __name__ == "__main__":
    key = jax.random.PRNGKey(0)
    k_in, k_t0, k_t1 = jax.random.split(key, 3)

    # Small shapes consistent with the module: NCHW = (2, 4, 16, 16)
    a, b, c, d = 2, 4, 16, 16
    x = jax.random.normal(k_in, (a, b, c, d), dtype=jnp.float32)

    # __init__: deterministic synthetic target feature maps -> target grams
    target_features = [
        jax.random.normal(k_t0, (a, b, c, d), dtype=jnp.float32),
        jax.random.normal(k_t1, (a, b, c, d), dtype=jnp.float32),
    ]
    target_grams = [gram_matrix_ref(f) for f in target_features]
    t_mean, t_var = precompute_target_stats(target_grams)

    # Reference (plain JAX, highest precision)
    g_ref = gram_matrix_ref(x)
    mse = lambda p, q: jnp.mean((p - q) ** 2)
    loss_ref = sum(mse(g_ref, t) for t in target_grams) / len(target_grams)

    configs = [
        dict(),                                 # auto tiling / auto core split
        dict(block_k=128),                      # multi-step K accumulation
        dict(block_k=128, split_k_cores=2),     # split-K partial grams
        dict(block_m=64, block_k=128),          # nm > 1: sliced lhs path
    ]
    for cfg in configs:
        out, loss, g = style_loss_forward(x, t_mean, t_var, **cfg)
        jax.block_until_ready((out, loss, g))
        assert jnp.allclose(g, g_ref, rtol=1e-5, atol=1e-5), f"gram mismatch: {cfg}"
        assert jnp.allclose(loss, loss_ref, rtol=5e-4, atol=1e-6), f"loss mismatch: {cfg}"
        assert jnp.array_equal(out, x), "forward must return its input"

    print("KERNEL_OK")
</pallas_src>

<mosaic_0001>
module attributes {stable_mosaic.version = 11 : i64} {
  func.func @_gram_kernel(%arg0: i32, %arg1: i32, %arg2: i32, %arg3: memref<128x256xf32, #tpu.memory_space<vmem>>, %arg4: memref<1x128x128xf32, #tpu.memory_space<vmem>>) attributes {dimension_semantics = [#tpu.dimension_semantics<parallel>, #tpu.dimension_semantics<parallel>, #tpu.dimension_semantics<arbitrary>], iteration_bounds = array<i64: 1, 1, 1>, scalar_prefetch = 0 : i64, scratch_operands = 0 : i64, tpu.core_type = #tpu.core_type<tc>, window_params = [{transform_indices = @transform_0, window_bounds = array<i64: 128, 256>}, {transform_indices = @transform_1, window_bounds = array<i64: 1, 128, 128>}]} {
    %c0_i32 = arith.constant 0 : i32
    %0 = arith.cmpi eq, %arg2, %c0_i32 : i32
    %1 = arith.extui %0 : i1 to i32
    %c0_i32_0 = arith.constant 0 : i32
    %2 = arith.cmpi ne, %1, %c0_i32_0 : i32
    scf.if %2 {
      %cst_12 = arith.constant 0.000000e+00 : f32
      %15 = vector.broadcast %cst_12 : f32 to vector<128x128xf32>
      %c0_13 = arith.constant 0 : index
      %c0_14 = arith.constant 0 : index
      %c0_15 = arith.constant 0 : index
      %16 = vector.load %arg4[%c0_13, %c0_14, %c0_15] : memref<1x128x128xf32, #tpu.memory_space<vmem>>, vector<1x128x128xf32>
      %17 = vector.shape_cast %16 : vector<1x128x128xf32> to vector<128x128xf32>
      %18 = vector.shape_cast %15 : vector<128x128xf32> to vector<1x128x128xf32>
      tpu.vector_store %arg4[%c0_13, %c0_14, %c0_15], %18 {strides = array<i32>} : memref<1x128x128xf32, #tpu.memory_space<vmem>>, vector<1x128x128xf32>,
    } else {
    }
    %c0 = arith.constant 0 : index
    %c0_1 = arith.constant 0 : index
    %3 = vector.load %arg3[%c0, %c0_1] : memref<128x256xf32, #tpu.memory_space<vmem>>, vector<128x256xf32>
    %c0_2 = arith.constant 0 : index
    %c0_3 = arith.constant 0 : index
    %c0_4 = arith.constant 0 : index
    %4 = vector.load %arg4[%c0_2, %c0_3, %c0_4] : memref<1x128x128xf32, #tpu.memory_space<vmem>>, vector<1x128x128xf32>
    %5 = vector.shape_cast %4 : vector<1x128x128xf32> to vector<128x128xf32>
    %c0_5 = arith.constant 0 : index
    %c0_6 = arith.constant 0 : index
    %6 = vector.load %arg3[%c0_5, %c0_6] : memref<128x256xf32, #tpu.memory_space<vmem>>, vector<128x256xf32>
    %cst = arith.constant dense<0.000000e+00> : vector<128x128xf32>
    %7 = tpu.matmul %3, %6, %cst {dimension_numbers = #tpu.dot_dimension_numbers<[1], [1], [0], [0], [0, 0, 1, 0], [], []>} : vector<128x256xf32>, vector<128x256xf32>, vector<128x128xf32> -> vector<128x128xf32>
    %8 = arith.addf %5, %7 : vector<128x128xf32>
    %c0_7 = arith.constant 0 : index
    %c0_8 = arith.constant 0 : index
    %c0_9 = arith.constant 0 : index
    %9 = vector.load %arg4[%c0_7, %c0_8, %c0_9] : memref<1x128x128xf32, #tpu.memory_space<vmem>>, vector<1x128x128xf32>
    %10 = vector.shape_cast %9 : vector<1x128x128xf32> to vector<128x128xf32>
    %11 = vector.shape_cast %8 : vector<128x128xf32> to vector<1x128x128xf32>
    tpu.vector_store %arg4[%c0_7, %c0_8, %c0_9], %11 {strides = array<i32>} : memref<1x128x128xf32, #tpu.memory_space<vmem>>, vector<1x128x128xf32>,
    %c0_i32_10 = arith.constant 0 : i32
    %12 = arith.cmpi eq, %arg2, %c0_i32_10 : i32
    %13 = arith.extui %12 : i1 to i32
    %c0_i32_11 = arith.constant 0 : i32
    %14 = arith.cmpi ne, %13, %c0_i32_11 : i32
    scf.if %14 {
      %c0_12 = arith.constant 0 : index
      %c0_13 = arith.constant 0 : index
      %c0_14 = arith.constant 0 : index
      %15 = vector.load %arg4[%c0_12, %c0_13, %c0_14] : memref<1x128x128xf32, #tpu.memory_space<vmem>>, vector<1x128x128xf32>
      %16 = vector.shape_cast %15 : vector<1x128x128xf32> to vector<128x128xf32>
      %cst_15 = arith.constant 4.8828125E-4 : f32
      %17 = vector.broadcast %cst_15 : f32 to vector<128x128xf32>
      %18 = arith.mulf %16, %17 : vector<128x128xf32>
      %c0_16 = arith.constant 0 : index
      %c0_17 = arith.constant 0 : index
      %c0_18 = arith.constant 0 : index
      %19 = vector.load %arg4[%c0_16, %c0_17, %c0_18] : memref<1x128x128xf32, #tpu.memory_space<vmem>>, vector<1x128x128xf32>
      %20 = vector.shape_cast %19 : vector<1x128x128xf32> to vector<128x128xf32>
      %21 = vector.shape_cast %18 : vector<128x128xf32> to vector<1x128x128xf32>
      tpu.vector_store %arg4[%c0_16, %c0_17, %c0_18], %21 {strides = array<i32>} : memref<1x128x128xf32, #tpu.memory_space<vmem>>, vector<1x128x128xf32>,
    } else {
    }
    return
  }
  func.func @transform_0(%arg0: i32, %arg1: i32, %arg2: i32) -> (i32, i32) {
    %c1_i32 = arith.constant 1 : i32
    %0 = arith.muli %arg0, %c1_i32 : i32
    %1 = arith.addi %0, %arg2 : i32
    %c0_i32 = arith.constant 0 : i32
    %c0_i32_0 = arith.constant 0 : i32
    return %c0_i32, %1 : i32, i32
  }
  func.func @transform_1(%arg0: i32, %arg1: i32, %arg2: i32) -> (i32, i32, i32) {
    %c0_i32 = arith.constant 0 : i32
    %c0_i32_0 = arith.constant 0 : i32
    return %arg0, %arg1, %c0_i32 : i32, i32, i32
  }
}

</mosaic_0001>

<bundles_post_ra>
// kernel: tpu_custom_call.1
= control target key start
LH: loop header
LB: loop body
LE: loop exit
PB: predicated region body
PF: predicated region fallthrough
CT: control target
= control target key end

     0   :  { %6 = vsyncpa [#allocation3], 0  ;;  %s534_s0 = inlined_call_operand.hbm [shape: f32[128,256], index: 0, kind: input, shape index: {}]   ;;  %s535_s1 = inlined_call_operand.hbm [shape: f32[1,128,128], index: 1, kind: output, shape index: {}]  }
   0x1   :  { %7 = vsyncpa [#allocation4], 0  ;;  %s16_s8 = sshll.u32 %s534_s0, 4  ;;  %s422_s9 = smov [#allocation2]   ;;  %s17_s8 = int_to_ptr.hbm [resolvable:$true] %s16_s8 }
   0x2   :  { %s18_s10 = sshll.u32 %s422_s9, 4  ;;  %s423_s11 = smov 256   ;;  %s19_s10 = int_to_ptr.vmem [resolvable:$true] %s18_s10 }
   0x3   :  { %s424_s12 = smov 16  }
   0x4   :  { %24 = dma.hbm_to_vmem [thread:$0]  %s17_s8, 4096, %s19_s10, [#allocation3], %s423_s11, %s423_s11, %s424_s12  }
   0x5   :  { %418 = dma.done.wait [#allocation3], 4096  }
   0x6   :  { %419 = vsyncadd [#allocation3], 4294963200  ;;  %v441_v0 = vld [vmem:[#allocation2 + $0xf0] sm:$0xff]  ;;  %v443_v1 = vld [vmem:[#allocation2 + $0xf8] sm:$0xff]  ;;  %s425_s0 = smov [#allocation5]   ;;  %s318_s16 = sshll.u32 %s535_s1, 4  ;;  %s319_s16 = int_to_ptr.hbm [resolvable:$true] %s318_s16 }
   0x7   :  { %331 = vmatpush.xpose.msra.mxu2 %v441_v0  ;;  %347 = vmatpush.xpose.msra.mxu3 %v443_v1  ;;  %v447_v2 = vld [vmem:[#allocation2 + $0xe0] sm:$0xff]  ;;  %v449_v3 = vld [vmem:[#allocation2 + $0xe8] sm:$0xff]  ;;  %v455_v4 = vld [vmem:[#allocation2 + $0xd0] sm:$0xff]  ;;  %s316_s13 = sshll.u32 %s425_s0, 4  ;;  %s426_s17 = smov 128   ;;  %s317_s13 = int_to_ptr.vmem [resolvable:$true] %s316_s13 }
   0x8   :  { %99 = vmatpush.xpose.msra.mxu0 %v441_v0  ;;  %164 = vmatpush.xpose.msra.mxu1 %v443_v1  ;;  %v457_v5 = vld [vmem:[#allocation2 + $0xd8] sm:$0xff]  ;;  %v463_v6 = vld [vmem:[#allocation2 + $0xc0] sm:$0xff]  ;;  %v465_v7 = vld [vmem:[#allocation2 + $0xc8] sm:$0xff]  ;;  %s427_s18 = smov 8  }
   0x9   :  { %v471_v8 = vld [vmem:[#allocation2 + $0xb0] sm:$0xff]  ;;  %v473_v9 = vld [vmem:[#allocation2 + $0xb8] sm:$0xff]  ;;  %v479_v10 = vld [vmem:[#allocation2 + $0xa0] sm:$0xff] }
   0xa   :  { %v481_v11 = vld [vmem:[#allocation2 + $0xa8] sm:$0xff]  ;;  %v487_v12 = vld [vmem:[#allocation2 + $0x90] sm:$0xff]  ;;  %v489_v13 = vld [vmem:[#allocation2 + $0x98] sm:$0xff] }
   0xb   :  { %332 = vmatpush.xpose.msra.mxu2 %v447_v2  ;;  %348 = vmatpush.xpose.msra.mxu3 %v449_v3  ;;  %v67_v14 = vld [vmem:[#allocation2 + $0x80] sm:$0xff]  ;;  %v68_v15 = vld [vmem:[#allocation2 + $0x88] sm:$0xff]  ;;  %v497_v16 = vld [vmem:[#allocation2 + $0x70] sm:$0xff] }
   0xc   :  { %100 = vmatpush.xpose.msra.mxu0 %v447_v2  ;;  %165 = vmatpush.xpose.msra.mxu1 %v449_v3  ;;  %v499_v17 = vld [vmem:[#allocation2 + $0x78] sm:$0xff]  ;;  %v503_v18 = vld [vmem:[#allocation2 + $0x60] sm:$0xff]  ;;  %v505_v19 = vld [vmem:[#allocation2 + $0x68] sm:$0xff] }
   0xd   :  { %v61_v20 = vld [vmem:[#allocation2 + $0x50] sm:$0xff]  ;;  %v62_v21 = vld [vmem:[#allocation2 + $0x58] sm:$0xff]  ;;  %v59_v22 = vld [vmem:[#allocation2 + $0x40] sm:$0xff] }
   0xe   :  { %v60_v23 = vld [vmem:[#allocation2 + $0x48] sm:$0xff]  ;;  %v57_v24 = vld [vmem:[#allocation2 + $0x30] sm:$0xff]  ;;  %v58_v25 = vld [vmem:[#allocation2 + $0x38] sm:$0xff] }
   0xf   :  { %333 = vmatpush.xpose.msra.mxu2 %v455_v4  ;;  %349 = vmatpush.xpose.msra.mxu3 %v457_v5  ;;  %v55_v26 = vld [vmem:[#allocation2 + $0x20] sm:$0xff]  ;;  %v56_v27 = vld [vmem:[#allocation2 + $0x28] sm:$0xff]  ;;  %v53_v28 = vld [vmem:[#allocation2 + $0x10] sm:$0xff] }
  0x10   :  { %101 = vmatpush.xpose.msra.mxu0 %v455_v4  ;;  %166 = vmatpush.xpose.msra.mxu1 %v457_v5  ;;  %v54_v29 = vld [vmem:[#allocation2 + $0x18] sm:$0xff]  ;;  %v51_v30 = vld [vmem:[#allocation2] sm:$0xff]  ;;  %v52_v31 = vld [vmem:[#allocation2 + $0x8] sm:$0xff] }
  0x13   :  { %334 = vmatpush.xpose.msra.mxu2 %v463_v6  ;;  %350 = vmatpush.xpose.msra.mxu3 %v465_v7 }
  0x14   :  { %102 = vmatpush.xpose.msra.mxu0 %v463_v6  ;;  %167 = vmatpush.xpose.msra.mxu1 %v465_v7 }
  0x17   :  { %335 = vmatpush.xpose.msra.mxu2 %v471_v8  ;;  %351 = vmatpush.xpose.msra.mxu3 %v473_v9 }
  0x18   :  { %103 = vmatpush.xpose.msra.mxu0 %v471_v8  ;;  %168 = vmatpush.xpose.msra.mxu1 %v473_v9 }
  0x1b   :  { %336 = vmatpush.xpose.msra.mxu2 %v479_v10  ;;  %352 = vmatpush.xpose.msra.mxu3 %v481_v11 }
  0x1c   :  { %104 = vmatpush.xpose.msra.mxu0 %v479_v10  ;;  %169 = vmatpush.xpose.msra.mxu1 %v481_v11 }
  0x1f   :  { %337 = vmatpush.xpose.msra.mxu2 %v487_v12  ;;  %353 = vmatpush.xpose.msra.mxu3 %v489_v13 }
  0x20   :  { %105 = vmatpush.xpose.msra.mxu0 %v487_v12  ;;  %170 = vmatpush.xpose.msra.mxu1 %v489_v13 }
  0x23   :  { %338 = vmatpush.xpose.msra.mxu2 %v67_v14  ;;  %354 = vmatpush.xpose.msra.mxu3 %v68_v15 }
  0x24   :  { %106 = vmatpush.xpose.msra.mxu0 %v67_v14  ;;  %171 = vmatpush.xpose.msra.mxu1 %v68_v15 }
  0x27   :  { %339 = vmatpush.xpose.msra.mxu2 %v497_v16  ;;  %355 = vmatpush.xpose.msra.mxu3 %v499_v17 }
  0x28   :  { %107 = vmatpush.xpose.msra.mxu0 %v497_v16  ;;  %172 = vmatpush.xpose.msra.mxu1 %v499_v17 }
  0x2b   :  { %340 = vmatpush.xpose.msra.mxu2 %v503_v18  ;;  %356 = vmatpush.xpose.msra.mxu3 %v505_v19 }
  0x2c   :  { %108 = vmatpush.xpose.msra.mxu0 %v503_v18  ;;  %173 = vmatpush.xpose.msra.mxu1 %v505_v19 }
  0x2f   :  { %341 = vmatpush.xpose.msra.mxu2 %v61_v20  ;;  %357 = vmatpush.xpose.msra.mxu3 %v62_v21 }
  0x30   :  { %109 = vmatpush.xpose.msra.mxu0 %v61_v20  ;;  %174 = vmatpush.xpose.msra.mxu1 %v62_v21 }
  0x33   :  { %342 = vmatpush.xpose.msra.mxu2 %v59_v22  ;;  %358 = vmatpush.xpose.msra.mxu3 %v60_v23 }
  0x34   :  { %110 = vmatpush.xpose.msra.mxu0 %v59_v22  ;;  %175 = vmatpush.xpose.msra.mxu1 %v60_v23 }
  0x37   :  { %343 = vmatpush.xpose.msra.mxu2 %v57_v24  ;;  %359 = vmatpush.xpose.msra.mxu3 %v58_v25 }
  0x38   :  { %111 = vmatpush.xpose.msra.mxu0 %v57_v24  ;;  %176 = vmatpush.xpose.msra.mxu1 %v58_v25 }
  0x3b   :  { %344 = vmatpush.xpose.msra.mxu2 %v55_v26  ;;  %360 = vmatpush.xpose.msra.mxu3 %v56_v27 }
  0x3c   :  { %112 = vmatpush.xpose.msra.mxu0 %v55_v26  ;;  %177 = vmatpush.xpose.msra.mxu1 %v56_v27 }
  0x3f   :  { %345 = vmatpush.xpose.msra.mxu2 %v53_v28  ;;  %361 = vmatpush.xpose.msra.mxu3 %v54_v29 }
  0x40   :  { %113 = vmatpush.xpose.msra.mxu0 %v53_v28  ;;  %178 = vmatpush.xpose.msra.mxu1 %v54_v29 }
  0x43   :  { %346 = vmatpush.xpose.msra.mxu2 %v51_v30  ;;  %362 = vmatpush.xpose.msra.mxu3 %v52_v31 }
  0x44   :  { %114 = vmatpush.xpose.msra.mxu0 %v51_v30  ;;  %179 = vmatpush.xpose.msra.mxu1 %v52_v31 }
  0x46   :  { %139 = vmatmul.f32.vlgmr.msra.gmra.mxu2 %v67_v14  ;;  %204 = vmatmul.f32.vlgmr.msra.gmra.mxu3 %v68_v15 }
  0x47   :  { %115 = vmatmul.f32.vlgmr.msra.gmra.mxu0 %v51_v30  ;;  %180 = vmatmul.f32.vlgmr.msra.gmra.mxu1 %v52_v31 }
  0x4e   :  { %142 = vmatmul.f32.gmra.mxu2 %v487_v12  ;;  %207 = vmatmul.f32.gmra.mxu3 %v489_v13 }
  0x4f   :  { %118 = vmatmul.f32.gmra.mxu0 %v53_v28  ;;  %183 = vmatmul.f32.gmra.mxu1 %v54_v29 }
  0x56   :  { %145 = vmatmul.f32.gmra.mxu2 %v479_v10  ;;  %210 = vmatmul.f32.gmra.mxu3 %v481_v11 }
  0x57   :  { %121 = vmatmul.f32.gmra.mxu0 %v55_v26  ;;  %186 = vmatmul.f32.gmra.mxu1 %v56_v27 }
  0x5e   :  { %148 = vmatmul.f32.gmra.mxu2 %v471_v8  ;;  %213 = vmatmul.f32.gmra.mxu3 %v473_v9 }
  0x5f   :  { %124 = vmatmul.f32.gmra.mxu0 %v57_v24  ;;  %189 = vmatmul.f32.gmra.mxu1 %v58_v25 }
  0x66   :  { %151 = vmatmul.f32.gmra.mxu2 %v463_v6  ;;  %216 = vmatmul.f32.gmra.mxu3 %v465_v7 }
  0x67   :  { %127 = vmatmul.f32.gmra.mxu0 %v59_v22  ;;  %192 = vmatmul.f32.gmra.mxu1 %v60_v23 }
  0x6e   :  { %154 = vmatmul.f32.gmra.mxu2 %v455_v4  ;;  %219 = vmatmul.f32.gmra.mxu3 %v457_v5 }
  0x6f   :  { %130 = vmatmul.f32.gmra.mxu0 %v61_v20  ;;  %195 = vmatmul.f32.gmra.mxu1 %v62_v21 }
  0x76   :  { %157 = vmatmul.f32.gmra.mxu2 %v447_v2  ;;  %222 = vmatmul.f32.gmra.mxu3 %v449_v3 }
  0x77   :  { %133 = vmatmul.f32.gmra.mxu0 %v503_v18  ;;  %198 = vmatmul.f32.gmra.mxu1 %v505_v19 }
  0x7e   :  { %160 = vmatmul.f32.gmra.mxu2 %v441_v0  ;;  %225 = vmatmul.f32.gmra.mxu3 %v443_v1 }
  0x7f   :  { %136 = vmatmul.f32.gmra.mxu0 %v497_v16  ;;  %201 = vmatmul.f32.gmra.mxu1 %v499_v17 }
  0xc4   :  { %v116_v32 = vpop.f32.mrf.mxu0  ;;  %v181_v33 = vpop.f32.mrf.mxu1 }
  0xc5   :  { %v182_v34 = vadd.f32 %v181_v33, %v116_v32 }
  0xc7   :  { %v280_v36 = vmul.f32 0.00048828125, %v182_v34 }
  0xc9   :  { %v140_v35 = vpop.f32.mrf.mxu2  ;;  %v205_v37 = vpop.f32.mrf.mxu3  ;;  %296 = vst [vmem:[#allocation5] sm:$0xff] %v280_v36 }
  0xca   :  { %v206_v38 = vadd.f32 %v205_v37, %v140_v35 }
  0xcc   :  { %v119_v39 = vpop.f32.mrf.mxu0  ;;  %v184_v40 = vpop.f32.mrf.mxu1  ;;  %v288_v42 = vmul.f32 0.00048828125, %v206_v38 }
  0xcd   :  { %v185_v41 = vadd.f32 %v184_v40, %v119_v39 }
  0xce   :  { %304 = vst [vmem:[#allocation5 + $0x40] sm:$0xff] %v288_v42 }
  0xcf   :  { %v281_v44 = vmul.f32 0.00048828125, %v185_v41 }
  0xd1   :  { %v143_v43 = vpop.f32.mrf.mxu2  ;;  %v208_v45 = vpop.f32.mrf.mxu3  ;;  %297 = vst [vmem:[#allocation5 + $0x8] sm:$0xff] %v281_v44 }
  0xd2   :  { %v209_v46 = vadd.f32 %v208_v45, %v143_v43 }
  0xd4   :  { %v122_v47 = vpop.f32.mrf.mxu0  ;;  %v187_v48 = vpop.f32.mrf.mxu1  ;;  %v289_v50 = vmul.f32 0.00048828125, %v209_v46 }
  0xd5   :  { %v188_v49 = vadd.f32 %v187_v48, %v122_v47 }
  0xd6   :  { %305 = vst [vmem:[#allocation5 + $0x48] sm:$0xff] %v289_v50 }
  0xd7   :  { %v282_v52 = vmul.f32 0.00048828125, %v188_v49 }
  0xd9   :  { %v146_v51 = vpop.f32.mrf.mxu2  ;;  %v211_v53 = vpop.f32.mrf.mxu3  ;;  %298 = vst [vmem:[#allocation5 + $0x10] sm:$0xff] %v282_v52 }
  0xda   :  { %v212_v54 = vadd.f32 %v211_v53, %v146_v51 }
  0xdc   :  { %v125_v55 = vpop.f32.mrf.mxu0  ;;  %v190_v56 = vpop.f32.mrf.mxu1  ;;  %v290_v58 = vmul.f32 0.00048828125, %v212_v54 }
  0xdd   :  { %v191_v57 = vadd.f32 %v190_v56, %v125_v55 }
  0xde   :  { %306 = vst [vmem:[#allocation5 + $0x50] sm:$0xff] %v290_v58 }
  0xdf   :  { %v283_v60 = vmul.f32 0.00048828125, %v191_v57 }
  0xe1   :  { %v149_v59 = vpop.f32.mrf.mxu2  ;;  %v214_v61 = vpop.f32.mrf.mxu3  ;;  %299 = vst [vmem:[#allocation5 + $0x18] sm:$0xff] %v283_v60 }
  0xe2   :  { %v215_v62 = vadd.f32 %v214_v61, %v149_v59 }
  0xe4   :  { %v128_v63 = vpop.f32.mrf.mxu0  ;;  %v193_v0 = vpop.f32.mrf.mxu1  ;;  %v291_v2 = vmul.f32 0.00048828125, %v215_v62 }
  0xe5   :  { %v194_v1 = vadd.f32 %v193_v0, %v128_v63 }
  0xe6   :  { %307 = vst [vmem:[#allocation5 + $0x58] sm:$0xff] %v291_v2 }
  0xe7   :  { %v284_v4 = vmul.f32 0.00048828125, %v194_v1 }
  0xe9   :  { %v152_v3 = vpop.f32.mrf.mxu2  ;;  %v217_v5 = vpop.f32.mrf.mxu3  ;;  %300 = vst [vmem:[#allocation5 + $0x20] sm:$0xff] %v284_v4 }
  0xea   :  { %v218_v6 = vadd.f32 %v217_v5, %v152_v3 }
  0xec   :  { %v131_v7 = vpop.f32.mrf.mxu0  ;;  %v196_v8 = vpop.f32.mrf.mxu1  ;;  %v292_v10 = vmul.f32 0.00048828125, %v218_v6 }
  0xed   :  { %v197_v9 = vadd.f32 %v196_v8, %v131_v7 }
  0xee   :  { %308 = vst [vmem:[#allocation5 + $0x60] sm:$0xff] %v292_v10 }
  0xef   :  { %v285_v12 = vmul.f32 0.00048828125, %v197_v9 }
  0xf1   :  { %v155_v11 = vpop.f32.mrf.mxu2  ;;  %v220_v13 = vpop.f32.mrf.mxu3  ;;  %301 = vst [vmem:[#allocation5 + $0x28] sm:$0xff] %v285_v12 }
  0xf2   :  { %v221_v14 = vadd.f32 %v220_v13, %v155_v11 }
  0xf4   :  { %v134_v15 = vpop.f32.mrf.mxu0  ;;  %v199_v16 = vpop.f32.mrf.mxu1  ;;  %v293_v18 = vmul.f32 0.00048828125, %v221_v14 }
  0xf5   :  { %v200_v17 = vadd.f32 %v199_v16, %v134_v15 }
  0xf6   :  { %309 = vst [vmem:[#allocation5 + $0x68] sm:$0xff] %v293_v18 }
  0xf7   :  { %v286_v20 = vmul.f32 0.00048828125, %v200_v17 }
  0xf9   :  { %v158_v19 = vpop.f32.mrf.mxu2  ;;  %v223_v21 = vpop.f32.mrf.mxu3  ;;  %302 = vst [vmem:[#allocation5 + $0x30] sm:$0xff] %v286_v20 }
  0xfa   :  { %v224_v22 = vadd.f32 %v223_v21, %v158_v19 }
  0xfc   :  { %v137_v23 = vpop.f32.mrf.mxu0  ;;  %v202_v24 = vpop.f32.mrf.mxu1  ;;  %v294_v26 = vmul.f32 0.00048828125, %v224_v22 }
  0xfd   :  { %v203_v25 = vadd.f32 %v202_v24, %v137_v23 }
  0xfe   :  { %310 = vst [vmem:[#allocation5 + $0x70] sm:$0xff] %v294_v26 }
  0xff   :  { %v287_v28 = vmul.f32 0.00048828125, %v203_v25 }
 0x101   :  { %v161_v27 = vpop.f32.mrf.mxu2  ;;  %v226_v29 = vpop.f32.mrf.mxu3  ;;  %303 = vst [vmem:[#allocation5 + $0x38] sm:$0xff] %v287_v28 }
 0x102   :  { %v227_v30 = vadd.f32 %v226_v29, %v161_v27 }
 0x104   :  { %v295_v31 = vmul.f32 0.00048828125, %v227_v30 }
 0x106   :  { %311 = vst [vmem:[#allocation5 + $0x78] sm:$0xff] %v295_v31 }
 0x107   :  { %324 = dma.vmem_to_hbm [thread:$0]  %s317_s13, 2048, %s319_s16, [#allocation4], %s426_s17, %s426_s17, %s427_s18  }
 0x108   :  { %420 = dma.done.wait [#allocation4], 2048  }
 0x109   :  { %421 = vsyncadd [#allocation4], 4294965248 }
 0x10a   :  { %329 = vsyncpa [#allocation3], 1 }
 0x10b   :  { %330 = vsyncpa [#allocation4], 1 }

</bundles_post_ra>
